<compile_context>
chip_gen: v7x
topology: tpu7x:2x2x1
jax: 0.10.0
libtpu: 0.0.40
codegen_flags: <defaults>
</compile_context>

<pallas_src>
import jax
import jax.numpy as jnp
from jax.experimental import pallas as pl
from jax.experimental.pallas import tpu as pltpu

M = 2  # number of branches (x, pre_x); PyTorch __init__ default


def _vmem_capacity_bytes():
    """Physical VMEM per TensorCore; conservative 64 MiB (v7x) if unknown."""
    try:
        info = pltpu.get_tpu_info()
        cap = int(getattr(info, "vmem_capacity_bytes", 0))
        if cap > 0:
            return cap
    except Exception:
        pass
    return 64 << 20


def _choose_batch_tile(B, C, hw, itemsize, tile_budget_bytes):
    """Biggest batch tile whose double-buffered footprint fits the budget while
    keeping >=4 (else >=2, ideally even) grid steps for software pipelining
    and balanced work on v7x's two TensorCores."""
    per_b = 6 * C * hw * itemsize            # x, pre_x, out; each double-buffered
    divisors = [bt for bt in range(1, B + 1) if B % bt == 0]
    fitting = [bt for bt in divisors if bt * per_b <= tile_budget_bytes]
    if not fitting:
        # Even one batch item overflows the budget: fall back to bt=1 and let
        # vmem_limit grow to the real footprint (capped at physical VMEM).
        # TODO(synk): very large C*H*W tiles would need a spatially-tiled
        # two-pass (GAP then blend) variant; not implemented here.
        return 1

    def score(bt):
        steps = B // bt
        return (steps >= 4, steps >= 2, steps % 2 == 0 or steps == 1, bt)

    return max(fitting, key=score)


def _data_spec(shape, index_map, buffers):
    """BlockSpec for the streamed tensors; requests deeper buffering when the
    VMEM budget allows it (v5e/v6e), falling back to the default otherwise."""
    if buffers > 2 and hasattr(pl, "Buffered"):
        try:
            return pl.BlockSpec(shape, index_map, pipeline_mode=pl.Buffered(buffers))
        except Exception:
            pass
    return pl.BlockSpec(shape, index_map)


def sk_tune_forward(x, pre_x, w1, bn_scale, bn_shift, w2):
    """x, pre_x: (B, C, H, W).  w1: (d, C) fc1 weight.  bn_scale / bn_shift:
    (d,) or (d, 1) eval-mode BN affine.  w2: (M*C, d) fc2 weight with the
    branch-0 rows first (matches PyTorch's a_b.view(B, M, C, 1) layout)."""
    B, C, H, W = x.shape
    hw = H * W
    d = w1.shape[0]
    itemsize = jnp.dtype(x.dtype).itemsize

    # Free reshapes only -- no padding, no slicing => no extra HBM passes.
    x3 = x.reshape(B, C, hw)
    p3 = pre_x.reshape(B, C, hw)

    # Fold the eval-mode BN scale into the fc1 weight; keep the shift as bias.
    w1f = (bn_scale.reshape(d, 1) * w1).astype(jnp.float32)           # (d, C)
    bnb = bn_shift.reshape(1, d, 1).astype(jnp.float32)               # (1, d, 1)
    # softmax over M=2 branches == sigmoid(head_0 - head_1)  (exact for M=2),
    # so only the head difference is ever needed in-kernel.
    w_diff = (w2[:C] - w2[C:2 * C]).astype(jnp.float32)               # (C, d)

    vmem_cap = _vmem_capacity_bytes()
    # ~38 MiB tile budget on v7x (64 MiB VMEM), ~77 MiB on v5e/v6e (128 MiB).
    tile_budget = min((vmem_cap * 3) // 5, 96 << 20)
    bt = _choose_batch_tile(B, C, hw, itemsize, tile_budget)
    steps = B // bt
    per_copy = 3 * bt * C * hw * itemsize          # one buffer each for x, pre_x, out
    # Spend spare VMEM on deeper pipelining only when there are enough steps.
    buffers = 3 if (steps >= 3 and 3 * per_copy <= tile_budget) else 2
    weight_bytes = (2 * C * d + d) * 4
    need = buffers * per_copy + weight_bytes + (4 << 20)   # + compiler scratch headroom
    # Never clamp the limit below the actual footprint; only physical VMEM caps it.
    vmem_limit = int(min(max(need, 32 << 20), vmem_cap))

    inv_hw = 1.0 / hw   # divide by the TRUE spatial size

    def kernel(x_ref, p_ref, w1_ref, bnb_ref, wd_ref, out_ref):
        xv = x_ref[...]                                  # (bt, C, hw)
        pv = p_ref[...]
        # GAP over the spatial (lane) axis, accumulated in f32;
        # U = x + pre_x is never materialized.  Channels stay on sublanes for
        # the whole chain, so no relayouts are needed anywhere.
        s = (jnp.sum(xv, axis=-1, keepdims=True, dtype=jnp.float32)
             + jnp.sum(pv, axis=-1, keepdims=True, dtype=jnp.float32)) * inv_hw  # (bt,C,1)
        # fc1 (1x1 conv C->d, BN scale pre-folded) + shift + ReLU, batched over bt.
        w1b = jnp.broadcast_to(w1_ref[...], (bt, d, C))
        z = jnp.einsum('bij,bjk->bik', w1b, s,
                       preferred_element_type=jnp.float32)            # (bt, d, 1)
        z = jnp.maximum(z + bnb_ref[...], 0.0)
        # Fused fc2 heads + 2-way softmax: sigmoid of the head difference.
        wdb = jnp.broadcast_to(wd_ref[...], (bt, C, d))
        a = jnp.einsum('bij,bjk->bik', wdb, z,
                       preferred_element_type=jnp.float32)            # (bt, C, 1)
        wx = jax.nn.sigmoid(a).astype(xv.dtype)                       # (bt, C, 1)
        # V = x*wx + pre_x*(1-wx) == pre_x + (x - pre_x)*wx, broadcast over lanes.
        out_ref[...] = (pv + (xv - pv) * wx).astype(out_ref.dtype)

    # NOTE: channels ride the sublane axis; when C < 8 (demo-sized configs)
    # some sublane density is wasted -- real SK configs use C that is a
    # multiple of 8.  With B == 1 there is a single grid step, so one v7x
    # TensorCore idles; a channel-split core axis would be the fix there.
    out = pl.pallas_call(
        kernel,
        out_shape=jax.ShapeDtypeStruct((B, C, hw), x.dtype),
        grid_spec=pltpu.PrefetchScalarGridSpec(
            num_scalar_prefetch=0,
            grid=(steps,),
            in_specs=[
                _data_spec((bt, C, hw), lambda b: (b, 0, 0), buffers),   # x
                _data_spec((bt, C, hw), lambda b: (b, 0, 0), buffers),   # pre_x
                pl.BlockSpec((d, C), lambda b: (0, 0)),                  # scale-folded w1
                pl.BlockSpec((1, d, 1), lambda b: (0, 0, 0)),            # BN shift
                pl.BlockSpec((C, d), lambda b: (0, 0)),                  # w2a - w2b
            ],
            out_specs=_data_spec((bt, C, hw), lambda b: (b, 0, 0), buffers),
        ),
        compiler_params=pltpu.CompilerParams(
            dimension_semantics=("parallel",),
            vmem_limit_bytes=vmem_limit,
        ),
    )(x3, p3, w1f, bnb, w_diff)

    return out.reshape(B, C, H, W)


if __name__ == "__main__":
    key = jax.random.PRNGKey(0)
    B, C, H, W = 2, 4, 16, 16
    r, L = 16, 32
    d = max(C // r, L)  # = 32

    k = jax.random.split(key, 6)
    x = jax.random.normal(k[0], (B, C, H, W), jnp.float32)
    pre_x = jax.random.normal(k[1], (B, C, H, W), jnp.float32)

    # Deterministic synthetic parameters (not a checkpoint load).
    w1 = 0.1 * jax.random.normal(k[2], (d, C), jnp.float32)          # Conv2d(C, d, 1)
    w2 = 0.1 * jax.random.normal(k[3], (M * C, d), jnp.float32)      # Conv2d(d, M*C, 1)
    gamma = 1.0 + 0.1 * jax.random.normal(k[4], (d,), jnp.float32)   # BN weight
    beta = 0.1 * jax.random.normal(k[5], (d,), jnp.float32)          # BN bias
    running_mean = jnp.zeros((d,), jnp.float32)
    running_var = jnp.ones((d,), jnp.float32)
    eps = 1e-5
    # TODO(synk): BatchNorm is eval-mode (running stats) folded to scale/shift;
    # training-mode batch statistics are not reproduced here.
    inv_std = gamma / jnp.sqrt(running_var + eps)
    bn_scale = inv_std.reshape(d, 1)
    bn_shift = (beta - running_mean * inv_std).reshape(d, 1)

    out = sk_tune_forward(x, pre_x, w1, bn_scale, bn_shift, w2)
    out = jax.block_until_ready(out)

    # Pure-JAX reference (full softmax path) for a correctness check.
    U = x + pre_x
    s = U.mean(axis=(2, 3))                                              # (B, C)
    z = jnp.maximum(s @ w1.T * bn_scale[:, 0] + bn_shift[:, 0], 0.0)     # (B, d)
    a = (z @ w2.T).reshape(B, M, C)
    a = jax.nn.softmax(a, axis=1)
    ref = x * a[:, 0][:, :, None, None] + pre_x * a[:, 1][:, :, None, None]
    err = float(jnp.max(jnp.abs(out - ref)))
    assert jnp.allclose(out, ref, atol=1e-5, rtol=1e-5), err

    print("KERNEL_OK")
</pallas_src>

<mosaic_0001>
module attributes {stable_mosaic.version = 11 : i64} {
  func.func @kernel(%arg0: i32, %arg1: memref<1x4x256xf32, #tpu.memory_space<vmem>>, %arg2: memref<1x4x256xf32, #tpu.memory_space<vmem>>, %arg3: memref<32x4xf32, #tpu.memory_space<vmem>>, %arg4: memref<1x32x1xf32, #tpu.memory_space<vmem>>, %arg5: memref<4x32xf32, #tpu.memory_space<vmem>>, %arg6: memref<1x4x256xf32, #tpu.memory_space<vmem>>) attributes {dimension_semantics = [#tpu.dimension_semantics<parallel>], iteration_bounds = array<i64: 2>, scalar_prefetch = 0 : i64, scratch_operands = 0 : i64, tpu.core_type = #tpu.core_type<tc>, window_params = [{transform_indices = @transform_0, window_bounds = array<i64: 1, 4, 256>}, {transform_indices = @transform_1, window_bounds = array<i64: 1, 4, 256>}, {pipeline_mode = #tpu.pipeline_mode<synchronous>, transform_indices = @transform_2, window_bounds = array<i64: 32, 4>}, {pipeline_mode = #tpu.pipeline_mode<synchronous>, transform_indices = @transform_3, window_bounds = array<i64: 1, 32, 1>}, {pipeline_mode = #tpu.pipeline_mode<synchronous>, transform_indices = @transform_4, window_bounds = array<i64: 4, 32>}, {transform_indices = @transform_5, window_bounds = array<i64: 1, 4, 256>}]} {
    %c0 = arith.constant 0 : index
    %c0_0 = arith.constant 0 : index
    %c0_1 = arith.constant 0 : index
    %0 = vector.load %arg1[%c0, %c0_0, %c0_1] : memref<1x4x256xf32, #tpu.memory_space<vmem>>, vector<1x4x256xf32>
    %c0_2 = arith.constant 0 : index
    %c0_3 = arith.constant 0 : index
    %c0_4 = arith.constant 0 : index
    %1 = vector.load %arg2[%c0_2, %c0_3, %c0_4] : memref<1x4x256xf32, #tpu.memory_space<vmem>>, vector<1x4x256xf32>
    %cst = arith.constant dense<0.000000e+00> : vector<1x4xf32>
    %2 = vector.multi_reduction <add>, %0, %cst [2] : vector<1x4x256xf32> to vector<1x4xf32>
    %3 = vector.shape_cast %2 : vector<1x4xf32> to vector<1x4x1xf32>
    %cst_5 = arith.constant dense<0.000000e+00> : vector<1x4xf32>
    %4 = vector.multi_reduction <add>, %1, %cst_5 [2] : vector<1x4x256xf32> to vector<1x4xf32>
    %5 = vector.shape_cast %4 : vector<1x4xf32> to vector<1x4x1xf32>
    %6 = arith.addf %3, %5 : vector<1x4x1xf32>
    %cst_6 = arith.constant 3.906250e-03 : f32
    %7 = vector.broadcast %cst_6 : f32 to vector<1x4x1xf32>
    %8 = arith.mulf %6, %7 : vector<1x4x1xf32>
    %c0_7 = arith.constant 0 : index
    %c0_8 = arith.constant 0 : index
    %9 = vector.load %arg3[%c0_7, %c0_8] : memref<32x4xf32, #tpu.memory_space<vmem>>, vector<32x4xf32>
    %10 = vector.shape_cast %9 : vector<32x4xf32> to vector<1x32x4xf32>
    "tpu.trace_start"() <{level = 10 : i32, message = "bij,bjk->bik"}> : () -> ()
    %cst_9 = arith.constant dense<0.000000e+00> : vector<1x32x1xf32>
    %11 = tpu.matmul %10, %8, %cst_9 {dimension_numbers = #tpu.dot_dimension_numbers<[2], [1], [1], [2], [0, 0, 0, 1, 1, 2], [0], [0]>} : vector<1x32x4xf32>, vector<1x4x1xf32>, vector<1x32x1xf32> -> vector<1x32x1xf32>
    "tpu.trace_stop"() : () -> ()
    %c0_10 = arith.constant 0 : index
    %c0_11 = arith.constant 0 : index
    %c0_12 = arith.constant 0 : index
    %12 = vector.load %arg4[%c0_10, %c0_11, %c0_12] : memref<1x32x1xf32, #tpu.memory_space<vmem>>, vector<1x32x1xf32>
    %13 = arith.addf %11, %12 : vector<1x32x1xf32>
    %cst_13 = arith.constant 0.000000e+00 : f32
    %14 = vector.broadcast %cst_13 : f32 to vector<1x32x1xf32>
    %15 = arith.maximumf %13, %14 : vector<1x32x1xf32>
    %c0_14 = arith.constant 0 : index
    %c0_15 = arith.constant 0 : index
    %16 = vector.load %arg5[%c0_14, %c0_15] : memref<4x32xf32, #tpu.memory_space<vmem>>, vector<4x32xf32>
    %17 = vector.shape_cast %16 : vector<4x32xf32> to vector<1x4x32xf32>
    "tpu.trace_start"() <{level = 10 : i32, message = "bij,bjk->bik"}> : () -> ()
    %cst_16 = arith.constant dense<0.000000e+00> : vector<1x4x1xf32>
    %18 = tpu.matmul %17, %15, %cst_16 {dimension_numbers = #tpu.dot_dimension_numbers<[2], [1], [1], [2], [0, 0, 0, 1, 1, 2], [0], [0]>} : vector<1x4x32xf32>, vector<1x32x1xf32>, vector<1x4x1xf32> -> vector<1x4x1xf32>
    "tpu.trace_stop"() : () -> ()
    %19 = arith.negf %18 : vector<1x4x1xf32>
    %20 = math.exp %19 : vector<1x4x1xf32>
    %cst_17 = arith.constant 1.000000e+00 : f32
    %21 = vector.broadcast %cst_17 : f32 to vector<1x4x1xf32>
    %22 = arith.addf %21, %20 : vector<1x4x1xf32>
    %23 = arith.divf %21, %22 : vector<1x4x1xf32>
    %24 = arith.subf %0, %1 : vector<1x4x256xf32>
    %25 = vector.broadcast %23 : vector<1x4x1xf32> to vector<1x4x256xf32>
    %26 = arith.mulf %24, %25 : vector<1x4x256xf32>
    %27 = arith.addf %1, %26 : vector<1x4x256xf32>
    %c0_18 = arith.constant 0 : index
    %c0_19 = arith.constant 0 : index
    %c0_20 = arith.constant 0 : index
    %28 = vector.load %arg6[%c0_18, %c0_19, %c0_20] : memref<1x4x256xf32, #tpu.memory_space<vmem>>, vector<1x4x256xf32>
    tpu.vector_store %arg6[%c0_18, %c0_19, %c0_20], %27 {strides = array<i32>} : memref<1x4x256xf32, #tpu.memory_space<vmem>>, vector<1x4x256xf32>,
    return
  }
  func.func @transform_0(%arg0: i32) -> (i32, i32, i32) {
    %c0_i32 = arith.constant 0 : i32
    %c0_i32_0 = arith.constant 0 : i32
    %c0_i32_1 = arith.constant 0 : i32
    return %arg0, %c0_i32, %c0_i32_0 : i32, i32, i32
  }
  func.func @transform_1(%arg0: i32) -> (i32, i32, i32) {
    %c0_i32 = arith.constant 0 : i32
    %c0_i32_0 = arith.constant 0 : i32
    %c0_i32_1 = arith.constant 0 : i32
    return %arg0, %c0_i32, %c0_i32_0 : i32, i32, i32
  }
  func.func @transform_2(%arg0: i32) -> (i32, i32) {
    %c0_i32 = arith.constant 0 : i32
    %c0_i32_0 = arith.constant 0 : i32
    %c0_i32_1 = arith.constant 0 : i32
    return %c0_i32, %c0_i32_0 : i32, i32
  }
  func.func @transform_3(%arg0: i32) -> (i32, i32, i32) {
    %c0_i32 = arith.constant 0 : i32
    %c0_i32_0 = arith.constant 0 : i32
    %c0_i32_1 = arith.constant 0 : i32
    %c0_i32_2 = arith.constant 0 : i32
    return %c0_i32, %c0_i32_0, %c0_i32_1 : i32, i32, i32
  }
  func.func @transform_4(%arg0: i32) -> (i32, i32) {
    %c0_i32 = arith.constant 0 : i32
    %c0_i32_0 = arith.constant 0 : i32
    %c0_i32_1 = arith.constant 0 : i32
    return %c0_i32, %c0_i32_0 : i32, i32
  }
  func.func @transform_5(%arg0: i32) -> (i32, i32, i32) {
    %c0_i32 = arith.constant 0 : i32
    %c0_i32_0 = arith.constant 0 : i32
    %c0_i32_1 = arith.constant 0 : i32
    return %arg0, %c0_i32, %c0_i32_0 : i32, i32, i32
  }
}

</mosaic_0001>

<bundles_post_ra>
// kernel: tpu_custom_call.1
= control target key start
LH: loop header
LB: loop body
LE: loop exit
PB: predicated region body
PF: predicated region fallthrough
CT: control target
= control target key end

     0   :  { %10 = vsyncpa [#allocation3], 0  ;;  %s920_s0 = inlined_call_operand.vmem [shape: f32[2,4,256], index: 0, kind: input, shape index: {}]   ;;  %s921_s1 = inlined_call_operand.vmem [shape: f32[2,4,256], index: 1, kind: input, shape index: {}]   ;;  %s922_s2 = inlined_call_operand.vmem [shape: f32[32,4], index: 2, kind: input, shape index: {}]   ;;  %s923_s3 = inlined_call_operand.vmem [shape: f32[1,32,1], index: 3, kind: input, shape index: {}]   ;;  %s924_s4 = inlined_call_operand.vmem [shape: f32[4,32], index: 4, kind: input, shape index: {}]   ;;  %s925_s5 = inlined_call_operand.hbm [shape: f32[2,4,256], index: 5, kind: output, shape index: {}]  }
   0x1   :  { %12 = vsyncpa [#allocation3 + $0x1], 0  ;;  %s771_s18 = smov 0   ;;  %s773_s19 = smov 0  }
   0x2   :  { %s775_s20 = smov 0   ;;  %s777_s21 = smov 0  }
   0x3 LB: > { %s792_s22 = sadd.s32 4294967295, %s733_s21   ;;  %s560_s23 = sadd.s32 4294967294, %s733_s21   ;;  %s733_s21 = sphi %s777_s21, %s931_s21   ;;  %s729_s20 = sphi %s775_s20, %s930_s20   ;;  %s725_s19 = sphi %s773_s19, %s929_s19   ;;  %s721_s18 = sphi %s771_s18, %s928_s18  }
   0x4   : > { %s796_s24 = sadd.s32 1, %s733_s21   ;;  %s140_s25 = sadd.s32 1, %s729_s20 }
   0x5   : > { %s137_s26 = ssub.s32 %s733_s21, %s796_s24  ;;  %p150_p0 = scmp.ne.s32.totalorder %s729_s20, %s725_s19 }
   0x6   : > { %p138_p1 = scmp.eq.s32.totalorder %s137_s26, 0  ;;  %p151_p2 = scmp.eq.s32.totalorder %s792_s22, 1 }
   0x7   : > { %p156_p3 = scmp.ne.s32.totalorder %s725_s19, %s721_s18  ;;  %p157_p4 = scmp.eq.s32.totalorder %s560_s23, 1 }
   0x8   : > { %s807_s27 = scalar_select %p138_p1, %s729_s20, %s140_s25  }
   0x9   : > { %p809_p5 = por %p151_p2, %p150_p0  ;;  %p813_p6 = por %p157_p4, %p156_p3 }
   0xa   : > { %p563_p7 = scmp.ge.s32.totalorder %s733_s21, 1  ;;  %p200_p8 = scmp.lt.s32.totalorder %s733_s21, 3 }
   0xc   : > { %p201_p9 = pnand %p563_p7, %p200_p8 }
   0xd   : > { %p233_p10 = scmp.lt.s32.totalorder (!%p201_p9), %s792_s22, 1  ;;  %vm248_vm0 = vcmask (!%p201_p9), 1043456   ;;  %v264_v10 = vld [vmem:[%s922_s2] sm:$0xff] (!%p201_p9)  ;;  %vm272_vm1 = vcmask (!%p201_p9), 31744   ;;  %v265_v15 = vld [vmem:[%s922_s2 + $0x8] sm:$0xff] (!%p201_p9)  ;;  %v266_v16 = vld [vmem:[%s922_s2 + $0x10] sm:$0xff] (!%p201_p9)  ;;  %v466_v48 = vlaneseq (!%p201_p9) }
   0xe   : > { %204 = sbr.rel (%p201_p9) target bundleno = 795 (0x31b), region = 40  ;;  %596 = vmatprep.mubr.msk.f32.mxu0 (!%p201_p9), %vm272_vm1, %v264_v10  ;;  %v267_v17 = vld [vmem:[%s922_s2 + $0x18] sm:$0xff] (!%p201_p9)  ;;  %v735_v18 = vmov (!%p201_p9), 0.0|0.0   ;;  %vm736_vm2 = vmmov (!%p201_p9), 0   ;;  %v737_v19 = vmov (!%p201_p9), 0.0   ;;  %v269_v20 = vld [vmem:[%s923_s3 + $0x8] sm:$0xff] (!%p201_p9) }
   0xf   : > { %613 = vmatprep.subr.bf16.mxu1 (!%p201_p9), %v735_v18  ;;  %610 = vmatprep.mubr.msk.f32.mxu1 (!%p201_p9), %vm736_vm2, %v737_v19  ;;  %v268_v21 = vld [vmem:[%s923_s3] sm:$0xff] (!%p201_p9)  ;;  %v271_v26 = vld [vmem:[%s923_s3 + $0x18] sm:$0xff] (!%p201_p9)  ;;  %v270_v28 = vld [vmem:[%s923_s3 + $0x10] sm:$0xff] (!%p201_p9)  ;;  %vm378_vm3 = vcmask (!%p201_p9), 261120   ;;  %v738_v39 = vmov (!%p201_p9), 0   ;;  %v467_v50 = vshrl.u32 (!%p201_p9), %v466_v48, 7 }
  0x10   : > { %v377_v38 = vld [vmem:[%s924_s4] sm:$0xf] (!%p201_p9)  ;;  %663 = vset.pattern.permute.xlu1 (!%p201_p9), %v738_v39  ;;  %664 = vset.pattern.permute.xlu0 (!%p201_p9), %v738_v39  ;;  %v739_v46 = vmov (!%p201_p9), 839922192   ;;  %s230_s15 = sand.u32 (!%p201_p9), 1, %s725_s19   ;;  %s583_s17 = sshll.u32 (!%p201_p9), %s792_s22, 7 }
  0x11   : > { %v464_v47 = vunpack.c.l.s4 (!%p201_p9), %v739_v46  ;;  %s564_s16 = sshll.u32 (!%p201_p9), %s230_s15, 3  ;;  %s475_s7 = scalar_lea.sflag (!%p201_p9), [#allocation3], %s230_s15 }
  0x12   : > { %s232_s23 = scalar_lea.vmem (!%p201_p9), [#allocation2], %s564_s16 }
  0x13   : > { %v465_v49 = vunpack.c.0.s8 (!%p201_p9), %v464_v47  ;;  %s489_s25 = sshll.u32 (!%p201_p9), %s232_s23, 4  ;;  %s880_s25 = int_to_ptr.vmem [resolvable:$true] %s489_s25 }
  0x14   : > { %s671_s8 = scalar_lea.vmem (!%p201_p9), %s880_s25, 128 }
  0x15   : > { %s234_s30 = scalar_select %p233_p10, %s792_s22, 1  ;;  %v468_v51 = vsub.s32 %v465_v49, %v467_v50 }
  0x16   : > { %p672_p11 = scmp.ne.s32.totalorder %s880_s25, %s671_s8  ;;  %s740_s22 = smov [#allocation2]  }
  0x17   : > { %s581_s6 = sshll.u32 %s234_s30, 3 }
  0x18   : > { %s237_s9 = scalar_lea.vmem %s920_s0, %s581_s6  ;;  %s242_s12 = scalar_lea.vmem %s921_s1, %s581_s6 }
  0x19   : > { %v827_v0 = vld [vmem:[%s237_s9] sm:$0xff]  ;;  %s878_s6 = scalar_lea.hbm %s925_s5, %s583_s17  ;;  %p673_p12 = pnand %p672_p11, %p809_p5 }
  0x1a   : > { %v829_v1 = vld [vmem:[%s242_s12] sm:$0xff]  ;;  %v246_v2 = vcombine.high %v827_v0, %v827_v0  ;;  %v249_v3 = vsel %vm248_vm0, %v827_v0, 0.0  ;;  %s675_s9 = sshll.u32 %s740_s22, 4  ;;  %s676_s9 = int_to_ptr.vmem [resolvable:$false] %s675_s9 }
  0x1b   : > { %v255_v4 = vcombine.high %v829_v1, %v829_v1  ;;  %v257_v6 = vsel %vm248_vm0, %v829_v1, 0.0  ;;  %v458_v52 = vsub.f32 %v827_v0, %v829_v1  ;;  %p674_p13 = pneg %p673_p12  ;;  %s677_s10 = scalar_lea.vmem %s676_s9, 256 }
  0x1c   : > { %v250_v5 = vsel %vm248_vm0, %v246_v2, 0.0  ;;  %p678_p0 = scmp.lt.s32.totalorder %s880_s25, %s676_s9  ;;  %p679_p1 = scmp.lt.s32.totalorder %s677_s10, %s671_s8 }
  0x1d   : > { %v258_v7 = vsel %vm248_vm0, %v255_v4, 0.0  ;;  %v251_v8 = vadd.f32 %v250_v5, %v249_v3 }
  0x1e   : > { %v259_v9 = vadd.f32 %v258_v7, %v257_v6  ;;  %p680_p2 = por %p679_p1, %p678_p0 }
  0x1f   : > { %252 = vadd.xlane.f32.xlu0 %v251_v8 }
  0x20   : > { %p681_p3 = pnand %p680_p2, %p674_p13 }
  0x23   : > { %260 = vadd.xlane.f32.xlu0 %v259_v9 }
  0xac   : > { %v253_v11 = vpop.xlane.xlu0 %252 }
  0xb0   : > { %v261_v12 = vpop.xlane.xlu0 %260 }
  0xb1   : > { %v262_v13 = vadd.f32 %v261_v12, %v253_v11 }
  0xb3   : > { %v263_v14 = vmul.f32 0.00390625, %v262_v13 }
  0xb5   : > { %594 = vmatprep.subr.msk.mxu0 %vm248_vm0, %v263_v14 }
  0xb6   : > { %595 = vmatpush3.msk.msra.mxu0 %vm248_vm0, %v263_v14 }
  0xb7   : > { %597 = vmatmul.mubr.msk.f32.vlgmr.msra.gmra.mrb[0].mxu0 %vm272_vm1, %v265_v15 }
  0xb8   : > { %599 = vmatprep.mubr.msk.f32.mxu0 %vm272_vm1, %v266_v16 }
  0xbb   : > { %600 = vmatmul.mubr.msk.f32.gmra.mrb[2].mxu0 %vm272_vm1, %v267_v17 }
 0x18a   : > { %v598_v22 = vpop.f32.mrb[0].mxu0 }
 0x18b   : > { %v360_v23 = vadd.f32 %v598_v22, %v269_v20  ;;  %v354_v24 = vpop.f32.mrb[1].mxu0 }
 0x18c   : > { %v355_v25 = vadd.f32 %v354_v24, %v268_v21 }
 0x18d   : > { %v374_v27 = vmax.f32 %v360_v23, 0.0 }
 0x18e   : > { %v373_v29 = vmax.f32 %v355_v25, 0.0  ;;  %v601_v30 = vpop.f32.mrb[2].mxu0 }
 0x18f   : > { %v370_v31 = vadd.f32 %v601_v30, %v271_v26  ;;  %v364_v32 = vpop.f32.mrb[3].mxu0 }
 0x190   : > { %v365_v33 = vadd.f32 %v364_v32, %v270_v28  ;;  %v614_v34 = vpack.c.bf16 %v374_v27, %v373_v29 }
 0x191   : > { %v376_v35 = vmax.f32 %v370_v31, 0.0 }
 0x192   : > { %v375_v36 = vmax.f32 %v365_v33, 0.0  ;;  %615 = vmatpush3.bf16.msra.mxu1 %v614_v34 }
 0x193   : > { %616 = vmatprep.subr.bf16.mxu1 %v735_v18 }
 0x194   : > { %v617_v37 = vpack.c.bf16 %v376_v35, %v375_v36 }
 0x196   : > { %618 = vmatpush3.bf16.msra.mxu1 %v617_v37 }
 0x199   : > { %611 = vmatmul.mubr.msk.f32.vlgmr.msra.gmra.mrb[0].mxu1 %vm378_vm3, %v377_v38 }
 0x26c   : > { %v448_v40 = vpop.f32.mrb[0].mxu1 }
 0x26d   : > { %v575_v41 = vmul.f32 -1.442695, %v448_v40  ;;  %v612_v42 = vpop.f32.mrb[1].mxu1 }
 0x26f   : > { %667 = vpow2.f32 %v575_v41 }
 0x279   : > { %v668_v43 = vpop.eup %667 }
 0x27a   : > { %v455_v44 = vadd.f32 1.0, %v668_v43 }
 0x27c   : > { %669 = vrcp.f32 %v455_v44 }
 0x286   : > { %v670_v45 = vpop.eup %669 }
 0x287   : > { %461 = vperm.xlu1 %663, %v670_v45  }
 0x306   : > { %v462_v53 = vpop.permute.xlu1 %461 }
 0x307   : > { %v469_v54 = vrot.slane %v462_v53, %v468_v51 }
 0x309   : > { %v471_v55 = vmul.f32 %v469_v54, %v458_v52 }
 0x30b   : > { %v472_v56 = vadd.f32 %v471_v55, %v829_v1 }
 0x30d   : > { %473 = vst [vmem:[%s232_s23] sm:$0xff] %v472_v56 }
 0x30e   : > { %684 = shalt.err (!%p681_p3)
}
 0x30f   : > { %s685_s11 = scalar_lea.hbm %s878_s6, 128  ;;  %s689_s14 = scalar_lea.hbm %s925_s5, 256 }
 0x310   : > { %p686_p4 = scmp.ne.s32.totalorder %s878_s6, %s685_s11  ;;  %p690_p9 = scmp.lt.u32.totalorder %s878_s6, %s925_s5 }
 0x311   : > { %p691_p10 = scmp.lt.u32.totalorder %s689_s14, %s685_s11  ;;  %p693_p12 = scmp.lt.u32.totalorder %s685_s11, %s878_s6 }
 0x312   : > { %p687_p7 = pnand %p686_p4, %p809_p5 }
 0x313   : > { %p692_p11 = por %p691_p10, %p690_p9 }
 0x314   : > { %p688_p8 = pneg %p687_p7 }
 0x315   : > { %p694_p13 = por %p693_p12, %p692_p11 }
 0x317   : > { %p695_p0 = pnand %p694_p13, %p688_p8 }
 0x319   : > { %698 = shalt.err (!%p695_p0)
}
 0x31a   : > { %619 = dma.vmem_to_hbm [thread:$0]  (%p809_p5), %s880_s25, 128, %s878_s6, %s475_s7  }
 0x31b PF: > { %p625_p1 = scmp.ge.s32.totalorder %s733_s21, 2  ;;  %s501_s17 = sand.u32 1, %s721_s18  }
 0x31c   : > { %s502_s23 = scalar_lea.sflag [#allocation3], %s501_s17 }
 0x31d   : > { %p622_p2 = pnand %p625_p1, %p813_p6 }
 0x31f   : > { %716 = dma.done.wait (!%p622_p2), %s502_s23, 128  }
 0x320   : > { %718 = vsyncadd (!%p622_p2), %s502_s23, 4294967168  ;;  %p15_p3 = scmp.ge.s32.totalorder %s796_s24, 4   ;;  %s928_s18 = smov %s725_s19 }
 0x321   : > { %s929_s19 = smov %s729_s20  ;;  %s930_s20 = smov %s807_s27 }
 0x322   : > { %s931_s21 = smov %s796_s24  ;;  %17 = sbr.rel (!%p15_p3) target bundleno = 3 (0x3), region = 78 }
 0x329   :  { %507 = vsyncpa [#allocation3], 1 }
 0x32a   :  { %509 = vsyncpa [#allocation3 + $0x1], 1 }

</bundles_post_ra>
